<compile_context>
chip_gen: v5e
topology: v5e:2x2
jax: 0.10.0
libtpu: 0.0.40
codegen_flags: <defaults>
</compile_context>

<pallas_src>
import jax
import jax.numpy as jnp
from jax import lax
from jax.experimental import pallas as pl
from jax.experimental.pallas import tpu as pltpu


def _outconv_kernel(x_ref, w_ref, b_ref, o_ref):
    # x_ref: (TILE_N, C_in, T)   w_ref: (C_out, C_in)   b_ref: (C_out, 1) f32
    # o_ref: (TILE_N, C_out, T)
    w = w_ref[...]
    b = b_ref[...]                         # f32, added to the f32 accumulator
    tile_n = x_ref.shape[0]

    def one(i):
        acc = jnp.dot(w, x_ref[i], preferred_element_type=jnp.float32)  # (C_out, T) f32
        o_ref[i] = (acc + b).astype(o_ref.dtype)

    if tile_n == 1:
        one(0)
    else:
        def body(i, carry):
            one(i)
            return carry
        lax.fori_loop(0, tile_n, body, 0, unroll=(tile_n <= 8))


def _largest_divisor_leq(n, k):
    k = max(1, min(n, k))
    for d in range(k, 0, -1):
        if n % d == 0:
            return d
    return 1


def _choose_tiles(N, C_in, C_out, HW, itemsize, *, block_budget_bytes, min_grid_steps):
    """Pick (tile_n, tile_hw) so one input+output block is ~block_budget_bytes."""
    bytes_per_px = (C_in + C_out) * itemsize
    max_px = max(128, block_budget_bytes // bytes_per_px)

    if HW > max_px:
        # Large images: tile pixels within one image, lane-dense multiples of 512.
        tile_n = 1
        tile_hw = min(HW, max(512, (max_px // 512) * 512))
    else:
        # Small images: fold several batch images into one block (divisor of N,
        # so no masked leading-dim blocks).
        tile_hw = HW
        tile_n = _largest_divisor_leq(N, max(1, max_px // HW))

    # Megacore: try to keep >= min_grid_steps grid steps while each input block
    # stays >= ~1 MiB (below that we'd be per-step-overhead bound again).
    min_in_block_bytes = 1 << 20

    def nsteps(tn, thw):
        return pl.cdiv(N, tn) * pl.cdiv(HW, thw)

    while nsteps(tile_n, tile_hw) < min_grid_steps:
        shrunk = False
        if tile_n > 1:
            cand = _largest_divisor_leq(N, tile_n // 2)
            if cand < tile_n and cand * C_in * tile_hw * itemsize >= min_in_block_bytes:
                tile_n = cand
                shrunk = True
        if (not shrunk and tile_hw % 1024 == 0
                and tile_n * C_in * (tile_hw // 2) * itemsize >= min_in_block_bytes):
            tile_hw //= 2
            shrunk = True
        if not shrunk:
            break

    return tile_n, tile_hw


def outconv_1x1(x_nchw, weight, bias, *,
                block_budget_bytes=8 << 20,   # input+output bytes per pipeline buffer
                min_grid_steps=8,             # keep both v7x TensorCores busy when possible
                tile_hw=None, tile_n=None):   # manual overrides (testing / tuning)
    """1x1 conv, NCHW in / NCHW out. Matches nn.Conv2d(C_in, C_out, kernel_size=1).

    x_nchw: (N, C_in, H, W), weight: (C_out, C_in, 1, 1), bias: (C_out,).
    """
    N, C_in, H, W = x_nchw.shape
    C_out = weight.shape[0]
    HW = H * W
    itemsize = x_nchw.dtype.itemsize

    # Free reshapes (contiguous) — no transposes, no extra HBM traffic.
    x_flat = x_nchw.reshape(N, C_in, HW)
    w_mat = weight.reshape(C_out, C_in).astype(x_nchw.dtype)   # MXU operand dtype
    b_mat = bias.reshape(C_out, 1).astype(jnp.float32)         # bias stays f32

    if tile_hw is None or tile_n is None:
        auto_n, auto_hw = _choose_tiles(
            N, C_in, C_out, HW, itemsize,
            block_budget_bytes=block_budget_bytes, min_grid_steps=min_grid_steps)
        tile_n = auto_n if tile_n is None else tile_n
        tile_hw = auto_hw if tile_hw is None else tile_hw

    num_n_tiles = pl.cdiv(N, tile_n)
    num_hw_tiles = pl.cdiv(HW, tile_hw)       # Pallas masks the partial final pixel block
    grid = (num_n_tiles, num_hw_tiles)

    in_blk_bytes = tile_n * C_in * tile_hw * itemsize
    out_blk_bytes = tile_n * C_out * tile_hw * itemsize

    # Small blocks but several steps -> deepen the pipeline (DMA-issue-latency regime).
    use_deep_pipeline = in_blk_bytes < (256 << 10) and (num_n_tiles * num_hw_tiles) >= 4

    x_index = lambda n, t: (n, 0, t)
    if use_deep_pipeline:
        x_spec = pl.BlockSpec((tile_n, C_in, tile_hw), x_index,
                              pipeline_mode=pl.Buffered(3))
        o_spec = pl.BlockSpec((tile_n, C_out, tile_hw), x_index,
                              pipeline_mode=pl.Buffered(3))
    else:
        x_spec = pl.BlockSpec((tile_n, C_in, tile_hw), x_index)
        o_spec = pl.BlockSpec((tile_n, C_out, tile_hw), x_index)

    # Explicit scoped-VMEM limit sized from the real footprint; capped at 48 MiB
    # so it is valid on every generation (v7x physical VMEM is 64 MiB).
    n_bufs = 3 if use_deep_pipeline else 2
    resident_bytes = (w_mat.size * w_mat.dtype.itemsize
                      + b_mat.size * b_mat.dtype.itemsize)
    vmem_needed = n_bufs * (in_blk_bytes + out_blk_bytes) + resident_bytes
    vmem_limit = int(min(max(vmem_needed + (8 << 20), 32 << 20), 48 << 20))

    cost = pl.CostEstimate(
        flops=2 * N * HW * C_in * C_out,
        transcendentals=0,
        bytes_accessed=(x_flat.size + N * C_out * HW) * itemsize
        + w_mat.size * w_mat.dtype.itemsize + b_mat.size * b_mat.dtype.itemsize,
    )

    out_flat = pl.pallas_call(
        _outconv_kernel,
        out_shape=jax.ShapeDtypeStruct((N, C_out, HW), x_nchw.dtype),
        grid_spec=pltpu.PrefetchScalarGridSpec(
            num_scalar_prefetch=0,
            grid=grid,
            in_specs=[
                x_spec,
                pl.BlockSpec((C_out, C_in), lambda n, t: (0, 0)),   # VMEM-resident weight
                pl.BlockSpec((C_out, 1), lambda n, t: (0, 0)),      # VMEM-resident f32 bias
            ],
            out_specs=o_spec,
        ),
        compiler_params=pltpu.CompilerParams(
            dimension_semantics=("parallel", "parallel"),
            vmem_limit_bytes=vmem_limit),
        cost_estimate=cost,
    )(x_flat, w_mat, b_mat)

    return out_flat.reshape(N, C_out, H, W)


def init_outconv_params(key, in_channels, out_channels, dtype=jnp.float32):
    # Deterministic init mimicking nn.Conv2d defaults (uniform in +/- 1/sqrt(fan_in)).
    kw, kb = jax.random.split(key)
    fan_in = in_channels * 1 * 1
    bound = 1.0 / (fan_in ** 0.5)
    weight = jax.random.uniform(kw, (out_channels, in_channels, 1, 1),
                                minval=-bound, maxval=bound, dtype=dtype)
    bias = jax.random.uniform(kb, (out_channels,),
                              minval=-bound, maxval=bound, dtype=dtype)
    return weight, bias


def _conv1x1_ref(x, weight, bias):
    C_out = weight.shape[0]
    return (jnp.einsum("nchw,oc->nohw", x.astype(jnp.float32),
                       weight.reshape(C_out, -1).astype(jnp.float32))
            + bias.astype(jnp.float32)[None, :, None, None])


if __name__ == "__main__":
    key = jax.random.PRNGKey(0)
    kx, kp = jax.random.split(key)

    N, C_in, H, W = 2, 4, 16, 16
    C_out = 3

    x = jax.random.normal(kx, (N, C_in, H, W), dtype=jnp.float32)
    weight, bias = init_outconv_params(kp, C_in, C_out)

    # f32, auto byte-sized tiling (small image -> whole batch folded into one block).
    y = jax.block_until_ready(outconv_1x1(x, weight, bias))
    ref = _conv1x1_ref(x, weight, bias)
    assert y.shape == (N, C_out, H, W)
    assert jnp.allclose(y, ref, atol=1e-5, rtol=1e-5)

    # bf16 activations/weights, f32 bias + f32 accumulation inside the kernel.
    y_bf16 = jax.block_until_ready(
        outconv_1x1(x.astype(jnp.bfloat16), weight.astype(jnp.bfloat16), bias))
    assert y_bf16.dtype == jnp.bfloat16
    assert jnp.allclose(y_bf16.astype(jnp.float32), ref, atol=5e-2, rtol=5e-2)

    # Non-divisible spatial extent -> Pallas partial (masked) final pixel block.
    x2 = jax.random.normal(kx, (1, C_in, 10, 32), dtype=jnp.float32)  # HW = 320
    y2 = jax.block_until_ready(outconv_1x1(x2, weight, bias, tile_hw=256, tile_n=1))
    ref2 = _conv1x1_ref(x2, weight, bias)
    assert y2.shape == (1, C_out, 10, 32)
    assert jnp.allclose(y2, ref2, atol=1e-5, rtol=1e-5)

    # Forced small-block, many-step regime -> exercises the Buffered(3) deep pipeline path.
    x3 = jax.random.normal(kx, (1, C_in, 64, 512), dtype=jnp.float32)  # HW = 32768
    y3 = jax.block_until_ready(outconv_1x1(x3, weight, bias, tile_hw=2048, tile_n=1))
    ref3 = _conv1x1_ref(x3, weight, bias)
    assert jnp.allclose(y3, ref3, atol=1e-5, rtol=1e-5)

    print("KERNEL_OK")
</pallas_src>

<mosaic_0001>
module attributes {stable_mosaic.version = 11 : i64} {
  func.func @_outconv_kernel(%arg0: i32, %arg1: i32, %arg2: memref<2x4x256xf32, #tpu.memory_space<vmem>>, %arg3: memref<3x4xf32, #tpu.memory_space<vmem>>, %arg4: memref<3x1xf32, #tpu.memory_space<vmem>>, %arg5: memref<2x3x256xf32, #tpu.memory_space<vmem>>) attributes {dimension_semantics = [#tpu.dimension_semantics<parallel>, #tpu.dimension_semantics<parallel>], iteration_bounds = array<i64: 1, 1>, scalar_prefetch = 0 : i64, scratch_operands = 0 : i64, tpu.core_type = #tpu.core_type<tc>, window_params = [{transform_indices = @transform_0, window_bounds = array<i64: 2, 4, 256>}, {pipeline_mode = #tpu.pipeline_mode<synchronous>, transform_indices = @transform_1, window_bounds = array<i64: 3, 4>}, {pipeline_mode = #tpu.pipeline_mode<synchronous>, transform_indices = @transform_2, window_bounds = array<i64: 3, 1>}, {transform_indices = @transform_3, window_bounds = array<i64: 2, 3, 256>}]} {
    %c0 = arith.constant 0 : index
    %c0_0 = arith.constant 0 : index
    %0 = vector.load %arg3[%c0, %c0_0] : memref<3x4xf32, #tpu.memory_space<vmem>>, vector<3x4xf32>
    %c0_1 = arith.constant 0 : index
    %c0_2 = arith.constant 0 : index
    %1 = vector.load %arg4[%c0_1, %c0_2] : memref<3x1xf32, #tpu.memory_space<vmem>>, vector<3x1xf32>
    %c0_i32 = arith.constant 0 : i32
    %2 = arith.index_cast %c0_i32 : i32 to index
    %c0_3 = arith.constant 0 : index
    %c0_4 = arith.constant 0 : index
    %3 = vector.load %arg2[%2, %c0_3, %c0_4] : memref<2x4x256xf32, #tpu.memory_space<vmem>>, vector<1x4x256xf32>
    %4 = vector.shape_cast %3 : vector<1x4x256xf32> to vector<4x256xf32>
    %cst = arith.constant dense<0.000000e+00> : vector<3x256xf32>
    %5 = tpu.matmul %0, %4, %cst {dimension_numbers = #tpu.dot_dimension_numbers<[1], [0], [0], [1], [0, 0, 1, 1], [], []>} : vector<3x4xf32>, vector<4x256xf32>, vector<3x256xf32> -> vector<3x256xf32>
    %6 = vector.broadcast %1 : vector<3x1xf32> to vector<3x256xf32>
    %7 = arith.addf %5, %6 : vector<3x256xf32>
    %8 = arith.index_cast %c0_i32 : i32 to index
    %c0_5 = arith.constant 0 : index
    %c0_6 = arith.constant 0 : index
    %9 = vector.load %arg5[%8, %c0_5, %c0_6] : memref<2x3x256xf32, #tpu.memory_space<vmem>>, vector<1x3x256xf32>
    %10 = vector.shape_cast %9 : vector<1x3x256xf32> to vector<3x256xf32>
    %11 = vector.shape_cast %7 : vector<3x256xf32> to vector<1x3x256xf32>
    tpu.vector_store %arg5[%8, %c0_5, %c0_6], %11 {strides = array<i32>} : memref<2x3x256xf32, #tpu.memory_space<vmem>>, vector<1x3x256xf32>,
    %c1_i32 = arith.constant 1 : i32
    %12 = arith.index_cast %c1_i32 : i32 to index
    %c0_7 = arith.constant 0 : index
    %c0_8 = arith.constant 0 : index
    %13 = vector.load %arg2[%12, %c0_7, %c0_8] : memref<2x4x256xf32, #tpu.memory_space<vmem>>, vector<1x4x256xf32>
    %14 = vector.shape_cast %13 : vector<1x4x256xf32> to vector<4x256xf32>
    %cst_9 = arith.constant dense<0.000000e+00> : vector<3x256xf32>
    %15 = tpu.matmul %0, %14, %cst_9 {dimension_numbers = #tpu.dot_dimension_numbers<[1], [0], [0], [1], [0, 0, 1, 1], [], []>} : vector<3x4xf32>, vector<4x256xf32>, vector<3x256xf32> -> vector<3x256xf32>
    %16 = vector.broadcast %1 : vector<3x1xf32> to vector<3x256xf32>
    %17 = arith.addf %15, %16 : vector<3x256xf32>
    %18 = arith.index_cast %c1_i32 : i32 to index
    %c0_10 = arith.constant 0 : index
    %c0_11 = arith.constant 0 : index
    %19 = vector.load %arg5[%18, %c0_10, %c0_11] : memref<2x3x256xf32, #tpu.memory_space<vmem>>, vector<1x3x256xf32>
    %20 = vector.shape_cast %19 : vector<1x3x256xf32> to vector<3x256xf32>
    %21 = vector.shape_cast %17 : vector<3x256xf32> to vector<1x3x256xf32>
    tpu.vector_store %arg5[%18, %c0_10, %c0_11], %21 {strides = array<i32>} : memref<2x3x256xf32, #tpu.memory_space<vmem>>, vector<1x3x256xf32>,
    %c2_i32 = arith.constant 2 : i32
    return
  }
  func.func @transform_0(%arg0: i32, %arg1: i32) -> (i32, i32, i32) {
    %c0_i32 = arith.constant 0 : i32
    %c0_i32_0 = arith.constant 0 : i32
    return %arg0, %c0_i32, %arg1 : i32, i32, i32
  }
  func.func @transform_1(%arg0: i32, %arg1: i32) -> (i32, i32) {
    %c0_i32 = arith.constant 0 : i32
    %c0_i32_0 = arith.constant 0 : i32
    %c0_i32_1 = arith.constant 0 : i32
    return %c0_i32, %c0_i32_0 : i32, i32
  }
  func.func @transform_2(%arg0: i32, %arg1: i32) -> (i32, i32) {
    %c0_i32 = arith.constant 0 : i32
    %c0_i32_0 = arith.constant 0 : i32
    %c0_i32_1 = arith.constant 0 : i32
    return %c0_i32, %c0_i32_0 : i32, i32
  }
  func.func @transform_3(%arg0: i32, %arg1: i32) -> (i32, i32, i32) {
    %c0_i32 = arith.constant 0 : i32
    %c0_i32_0 = arith.constant 0 : i32
    return %arg0, %c0_i32, %arg1 : i32, i32, i32
  }
}

</mosaic_0001>

<bundles_post_ra>
// kernel: tpu_custom_call.1
= control target key start
LH: loop header
LB: loop body
LE: loop exit
PB: predicated region body
PF: predicated region fallthrough
CT: control target
= control target key end

     0   :  { %8 = vsyncpa [#allocation3], 0  ;;  %s199_s15 = smov [#allocation2]   ;;  %s200_s17 = smov 128   ;;  %s244_s0 = inlined_call_operand.hbm [shape: f32[2,4,256], index: 0, kind: input, shape index: {}]   ;;  %s245_s1 = inlined_call_operand.vmem [shape: f32[3,4], index: 1, kind: input, shape index: {}]   ;;  %s246_s2 = inlined_call_operand.vmem [shape: f32[3,1], index: 2, kind: input, shape index: {}]   ;;  %s247_s3 = inlined_call_operand.vmem [shape: f32[2,3,256], index: 3, kind: output, shape index: {}]  }
   0x1   :  { %s13_s14 = sshll.u32 %s244_s0, 4  ;;  %s15_s16 = sshll.u32 %s199_s15, 4  ;;  %s14_s14 = int_to_ptr.hbm [resolvable:$true] %s13_s14  ;;  %s16_s16 = int_to_ptr.vmem [resolvable:$true] %s15_s16 }
   0x2   :  { %s201_s18 = smov 8  }
   0x3   :  { %21 = dma.hbm_to_vmem [thread:$0]  %s14_s14, 256, %s16_s16, [#allocation3], %s200_s17, %s200_s17, %s201_s18  }
   0x4   :  { %197 = dma.done.wait [#allocation3], 256  }
   0x5   :  { %198 = vsyncadd [#allocation3], 4294967040  ;;  %v202_v0 = vmov 0   ;;  %v32_v1 = vld [vmem:[#allocation2] sm:$0xff]  ;;  %v31_v2 = vld [vmem:[%s246_s2] sm:$0x7] }
   0x6   :  { %172 = vset.pattern.permute.xlu0 %v202_v0  ;;  %39 = vst [vmem:[#allocation1] ss:$2 sm:$0xff] %v32_v1  ;;  %v98_v3 = vld [vmem:[#allocation2 + $0x8] sm:$0xff]  ;;  %vm46_vm0 = vcmask 1043456   ;;  %v30_v6 = vld [vmem:[%s245_s1] sm:$0x7] }
   0x7   :  { %35 = vperm.xlu0 %172, %v31_v2   ;;  %vm42_vm1 = vcmask 31744  }
   0xd   :  { %v40_v4 = vld.sshfl [vmem:[#allocation1] sm:$0xff pattern:$0x75316420]  ;;  %v41_v5 = vld.sshfl [vmem:[#allocation1 + $0x8] sm:$0xff pattern:$0x75316420] }
   0xe   :  { %100 = vst [vmem:[#allocation1] ss:$2 sm:$0xff] %v98_v3  ;;  %161 = vmatpush.msk.msra.mxu1 %vm46_vm0, %v41_v5  ;;  %159 = vmatpush.msk.msra.mxu0 %vm46_vm0, %v40_v4 }
   0xf   :  { %162 = vmatmul.msk.f32.vlgmr.msra.gmra.mxu1 %vm42_vm1, %v30_v6  ;;  %160 = vmatmul.msk.f32.vlgmr.msra.gmra.mxu0 %vm42_vm1, %v30_v6 }
  0x15   :  { %v101_v7 = vld.sshfl [vmem:[#allocation1] sm:$0xff pattern:$0x75316420]  ;;  %v102_v8 = vld.sshfl [vmem:[#allocation1 + $0x8] sm:$0xff pattern:$0x75316420] }
  0x16   :  { %163 = vmatpush.msk.msra.mxu2 %vm46_vm0, %v101_v7  ;;  %165 = vmatpush.msk.msra.mxu3 %vm46_vm0, %v102_v8 }
  0x17   :  { %164 = vmatmul.msk.f32.vlgmr.msra.gmra.mxu2 %vm42_vm1, %v30_v6  ;;  %166 = vmatmul.msk.f32.vlgmr.msra.gmra.mxu3 %vm42_vm1, %v30_v6 }
  0x79   :  { %v36_v9 = vpop.permute.xlu0 %35 }
  0x8c   :  { %v88_v10 = vpop.f32.mrf.mxu1  ;;  %v68_v11 = vpop.f32.mrf.mxu0 }
  0x8d   :  { %v89_v12 = vadd.f32 %v88_v10, %v36_v9  ;;  %v69_v13 = vadd.f32 %v68_v11, %v36_v9 }
  0x8f   :  { %v93_v14 = vrot.slane %v89_v12, 4 }
  0x91   :  { %v94_v15 = vsel %vm46_vm0, %v69_v13, %v93_v14 }
  0x92   :  { %96 = vst [vmem:[%s247_s3] sm:$0x77] %v94_v15 }
  0x9a   :  { %v124_v16 = vpop.f32.mrf.mxu2  ;;  %v144_v17 = vpop.f32.mrf.mxu3 }
  0x9b   :  { %v145_v18 = vadd.f32 %v144_v17, %v36_v9  ;;  %v125_v19 = vadd.f32 %v124_v16, %v36_v9 }
  0x9d   :  { %v149_v20 = vrot.slane %v145_v18, 4 }
  0x9f   :  { %v150_v21 = vsel %vm46_vm0, %v125_v19, %v149_v20 }
  0xa0   :  { %167 = vst [vmem:[%s247_s3 + $0x8] sm:$0x77] %v150_v21 }
  0xa1   :  { %158 = vsyncpa [#allocation3], 1 }

</bundles_post_ra>
